<compile_context>
chip_gen: v6e
topology: v6e:2x2x1
jax: 0.10.0
libtpu: 0.0.40
codegen_flags: <defaults>
</compile_context>

<pallas_src>
import functools
from collections import namedtuple

import jax
import jax.numpy as jnp
from jax.experimental import pallas as pl
from jax.experimental.pallas import tpu as pltpu


def _round_up(x, m):
    return (x + m - 1) // m * m


Meta = namedtuple("Meta", ["obs_dim", "num_act", "kp", "h1p", "h2p", "nap"])


# ----------------------------------------------------------------------------
# Kernel: whole MLP fused, one batch tile per grid step, weights resident.
# ----------------------------------------------------------------------------
def dqn_kernel(sg_ref, w1_ref, b1_ref, w2_ref, b2_ref, w3_ref, b3_ref, out_ref):
    # fc1: single MXU dot over the pre-merged [s, g - s] input (K = kp),
    # bf16 x bf16 -> f32 accumulation, bias add / ReLU in f32.
    h1 = jnp.dot(sg_ref[...], w1_ref[...],
                 preferred_element_type=jnp.float32) + b1_ref[...]
    h1 = jnp.maximum(h1, 0.0).astype(jnp.bfloat16)   # bf16 intermediate

    # fc2 + ReLU
    h2 = jnp.dot(h1, w2_ref[...],
                 preferred_element_type=jnp.float32) + b2_ref[...]
    h2 = jnp.maximum(h2, 0.0).astype(jnp.bfloat16)

    # fc3 (no activation); bf16 lane-dense writeback.
    q = jnp.dot(h2, w3_ref[...],
                preferred_element_type=jnp.float32) + b3_ref[...]
    out_ref[...] = q.astype(out_ref.dtype)


# ----------------------------------------------------------------------------
# One-time parameter preparation (OUTSIDE the hot path).
# ----------------------------------------------------------------------------
def prepare_params(params, obs_dim, num_act,
                   weight_dtype=jnp.bfloat16, lane_pad=128):
    """Transpose to (in,out), zero-pad K/lane dims, cast weights to bf16."""
    h1 = params["w1"].shape[0]
    h2 = params["w2"].shape[0]
    in1 = params["w1"].shape[1]                 # = 2 * obs_dim
    kp = _round_up(in1, 16)                     # bf16 sublane packing of K
    h1p = _round_up(h1, lane_pad)
    h2p = _round_up(h2, lane_pad)
    nap = _round_up(num_act, lane_pad)

    def pad2(a, shape):
        out = jnp.zeros(shape, a.dtype)
        return out.at[:a.shape[0], :a.shape[1]].set(a)

    w1t = params["w1"].T.astype(jnp.float32)    # (2*obs, h1)
    w2t = params["w2"].T.astype(jnp.float32)    # (h1, h2)
    w3t = params["w3"].T.astype(jnp.float32)    # (h2, num_act)

    prepped = {
        "w1": pad2(w1t, (kp, h1p)).astype(weight_dtype),
        "b1": pad2(params["b1"].reshape(1, -1).astype(jnp.float32), (1, h1p)),
        "w2": pad2(w2t, (h1p, h2p)).astype(weight_dtype),
        "b2": pad2(params["b2"].reshape(1, -1).astype(jnp.float32), (1, h2p)),
        "w3": pad2(w3t, (h2p, nap)).astype(weight_dtype),
        "b3": pad2(params["b3"].reshape(1, -1).astype(jnp.float32), (1, nap)),
    }
    meta = Meta(obs_dim=obs_dim, num_act=num_act,
                kp=kp, h1p=h1p, h2p=h2p, nap=nap)
    return prepped, meta


# ----------------------------------------------------------------------------
# Wrapper: batch grid (parallel), weights as resident full-array blocks.
# ----------------------------------------------------------------------------
def dqn_forward(s, g, prepped, meta, *, batch_tile=1024, out_dtype=jnp.float32):
    num_act = meta.num_act
    kp, h1p, h2p, nap = meta.kp, meta.h1p, meta.h2p, meta.nap
    B = s.shape[0]

    # Merged fc1 input built by XLA OUTSIDE the kernel: sg = [s, g - s]
    # (exact PyTorch concat semantics, no weight folding), K-padded to a
    # multiple of 16 and cast to bf16 (halves the input DMA).
    sg = jnp.concatenate([s, g - s], axis=-1)
    if kp != sg.shape[1]:
        sg = jnp.pad(sg, ((0, 0), (0, kp - sg.shape[1])))
    sg = sg.astype(jnp.bfloat16)

    # Batch tiling:
    #  * large B -> big tiles (amortize the ~0.35us per-grid-step overhead)
    #  * mid B   -> split into 2 tiles so v7x's 2nd TensorCore gets work
    #  * small B -> one sublane-aligned tile
    if B > batch_tile:
        tb = batch_tile
        bp = _round_up(B, tb)
    elif B >= 128:
        tb = _round_up((B + 1) // 2, 8)
        bp = 2 * tb
    else:
        tb = _round_up(B, 8)
        bp = tb
    if bp != B:
        sg = jnp.pad(sg, ((0, bp - B), (0, 0)))
    grid_steps = bp // tb

    # Deeper buffering for the batch-tiled streams once the grid is long
    # enough for the tiny per-step compute to expose activation/output DMAs.
    deep = pl.Buffered(3) if grid_steps >= 3 else None

    def act_spec(d):                       # tiled over batch
        if deep is not None:
            return pl.BlockSpec((tb, d), lambda i: (i, 0), pipeline_mode=deep)
        return pl.BlockSpec((tb, d), lambda i: (i, 0))

    def full_spec(r, c):                   # resident across grid steps
        return pl.BlockSpec((r, c), lambda i: (0, 0))

    # Advisory cost estimate for XLA's scheduler.
    flops = 2 * bp * (kp * h1p + h1p * h2p + h2p * nap)
    bytes_accessed = (
        bp * kp * 2 + bp * nap * 2                              # bf16 acts in/out
        + sum(int(prepped[k].size) * 2 for k in ("w1", "w2", "w3"))
        + sum(int(prepped[k].size) * 4 for k in ("b1", "b2", "b3")))
    cost = pl.CostEstimate(flops=flops, transcendentals=0,
                           bytes_accessed=bytes_accessed)

    out_p = pl.pallas_call(
        dqn_kernel,
        out_shape=jax.ShapeDtypeStruct((bp, nap), jnp.bfloat16),   # bf16 writeback
        grid=(grid_steps,),
        in_specs=[
            act_spec(kp),                 # sg
            full_spec(kp, h1p),           # w1
            full_spec(1, h1p),            # b1
            full_spec(h1p, h2p),          # w2
            full_spec(1, h2p),            # b2
            full_spec(h2p, nap),          # w3
            full_spec(1, nap),            # b3
        ],
        out_specs=act_spec(nap),
        compiler_params=pltpu.CompilerParams(
            dimension_semantics=("parallel",)),
        cost_estimate=cost,
    )(sg, prepped["w1"], prepped["b1"], prepped["w2"], prepped["b2"],
      prepped["w3"], prepped["b3"])

    # TODO(synk): for tiny-batch inference loops (esp. v7x) keep the ~0.5 MiB
    # of bf16 weights resident across calls (cross-call prefetch) instead of
    # re-DMA'ing them from HBM on every pallas_call.
    return out_p[:B, :num_act].astype(out_dtype)


# ----------------------------------------------------------------------------
# Init + references
# ----------------------------------------------------------------------------
def init_params(key, obs_dim, num_act, hidden_dims=(400, 300)):
    """Deterministic synthetic init (PyTorch Linear weight layout: (out, in))."""
    dims_in = [obs_dim * 2, hidden_dims[0], hidden_dims[1]]
    dims_out = [hidden_dims[0], hidden_dims[1], num_act]
    params = {}
    for i, (din, dout) in enumerate(zip(dims_in, dims_out), start=1):
        key, kw, kb = jax.random.split(key, 3)
        bound = 1.0 / jnp.sqrt(jnp.float32(din))
        params[f"w{i}"] = jax.random.uniform(
            kw, (dout, din), jnp.float32, minval=-bound, maxval=bound)
        params[f"b{i}"] = jax.random.uniform(
            kb, (dout,), jnp.float32, minval=-bound, maxval=bound)
    return params


def dqn_ref(s, g, params):
    """Full-precision pure-JAX reference matching the PyTorch forward."""
    sg = jnp.concatenate([s, g - s], axis=-1)
    x = jnp.maximum(sg @ params["w1"].T + params["b1"], 0.0)
    x = jnp.maximum(x @ params["w2"].T + params["b2"], 0.0)
    return x @ params["w3"].T + params["b3"]


def dqn_ref_prepped(s, g, prepped, meta):
    """Reference mirroring the kernel's exact bf16 casts / f32 accumulation."""
    f32 = jnp.float32
    sg = jnp.concatenate([s, g - s], axis=-1)
    if meta.kp != sg.shape[1]:
        sg = jnp.pad(sg, ((0, 0), (0, meta.kp - sg.shape[1])))
    sg = sg.astype(jnp.bfloat16)
    h1 = jnp.maximum(jnp.dot(sg, prepped["w1"], preferred_element_type=f32)
                     + prepped["b1"], 0.0).astype(jnp.bfloat16)
    h2 = jnp.maximum(jnp.dot(h1, prepped["w2"], preferred_element_type=f32)
                     + prepped["b2"], 0.0).astype(jnp.bfloat16)
    out = (jnp.dot(h2, prepped["w3"], preferred_element_type=f32)
           + prepped["b3"]).astype(jnp.bfloat16)
    return out[:, :meta.num_act].astype(f32)


if __name__ == "__main__":
    obs_dim, num_act = 16, 6
    hidden_dims = (400, 300)

    key = jax.random.PRNGKey(0)
    key, ks, kg = jax.random.split(key, 3)
    params = init_params(key, obs_dim, num_act, hidden_dims)

    # One-time parameter prep (transpose / pad / bf16) -- outside hot path.
    prepped, meta = prepare_params(params, obs_dim, num_act)

    # prepped is a traced (device-resident) argument; only meta is static.
    fwd = jax.jit(dqn_forward, static_argnums=3)

    # --- Small batch (grid = 1) -------------------------------------------
    B = 4
    s = jax.random.normal(ks, (B, obs_dim), jnp.float32)
    g = jax.random.normal(kg, (B, obs_dim), jnp.float32)
    out = jax.block_until_ready(fwd(s, g, prepped, meta))
    assert out.shape == (B, num_act)
    ref_q = dqn_ref_prepped(s, g, prepped, meta)
    assert jnp.allclose(out, ref_q, atol=1e-2, rtol=1e-2), "mismatch vs quantized ref"
    ref = dqn_ref(s, g, params)
    assert jnp.allclose(out, ref, atol=5e-2, rtol=5e-2), "mismatch vs f32 reference"

    # --- Mid batch (grid = 2: v7x core-aware split) -------------------------
    B2 = 160
    s2 = jax.random.normal(jax.random.PRNGKey(1), (B2, obs_dim), jnp.float32)
    g2 = jax.random.normal(jax.random.PRNGKey(2), (B2, obs_dim), jnp.float32)
    out2 = jax.block_until_ready(fwd(s2, g2, prepped, meta))
    assert out2.shape == (B2, num_act)
    assert jnp.allclose(out2, dqn_ref_prepped(s2, g2, prepped, meta),
                        atol=1e-2, rtol=1e-2), "mismatch (grid=2 path)"

    # --- Larger batch, small tile (grid = 3: exercises Buffered(3) path) ----
    fwd_t128 = jax.jit(functools.partial(dqn_forward, batch_tile=128),
                       static_argnums=3)
    B3 = 384
    s3 = jax.random.normal(jax.random.PRNGKey(3), (B3, obs_dim), jnp.float32)
    g3 = jax.random.normal(jax.random.PRNGKey(4), (B3, obs_dim), jnp.float32)
    out3 = jax.block_until_ready(fwd_t128(s3, g3, prepped, meta))
    assert out3.shape == (B3, num_act)
    assert jnp.allclose(out3, dqn_ref_prepped(s3, g3, prepped, meta),
                        atol=1e-2, rtol=1e-2), "mismatch (grid=3 / Buffered path)"

    print("KERNEL_OK")
</pallas_src>

<mosaic_0001>
module attributes {stable_mosaic.version = 11 : i64} {
  func.func @dqn_kernel(%arg0: i32, %arg1: memref<8x32xbf16, #tpu.memory_space<vmem>>, %arg2: memref<32x512xbf16, #tpu.memory_space<vmem>>, %arg3: memref<1x512xf32, #tpu.memory_space<vmem>>, %arg4: memref<512x384xbf16, #tpu.memory_space<vmem>>, %arg5: memref<1x384xf32, #tpu.memory_space<vmem>>, %arg6: memref<384x128xbf16, #tpu.memory_space<vmem>>, %arg7: memref<1x128xf32, #tpu.memory_space<vmem>>, %arg8: memref<8x128xbf16, #tpu.memory_space<vmem>>) attributes {dimension_semantics = [#tpu.dimension_semantics<parallel>], iteration_bounds = array<i64: 1>, scalar_prefetch = 0 : i64, scratch_operands = 0 : i64, tpu.core_type = #tpu.core_type<tc>, window_params = [{transform_indices = @transform_0, window_bounds = array<i64: 8, 32>}, {pipeline_mode = #tpu.pipeline_mode<synchronous>, transform_indices = @transform_1, window_bounds = array<i64: 32, 512>}, {pipeline_mode = #tpu.pipeline_mode<synchronous>, transform_indices = @transform_2, window_bounds = array<i64: 1, 512>}, {pipeline_mode = #tpu.pipeline_mode<synchronous>, transform_indices = @transform_3, window_bounds = array<i64: 512, 384>}, {pipeline_mode = #tpu.pipeline_mode<synchronous>, transform_indices = @transform_4, window_bounds = array<i64: 1, 384>}, {pipeline_mode = #tpu.pipeline_mode<synchronous>, transform_indices = @transform_5, window_bounds = array<i64: 384, 128>}, {pipeline_mode = #tpu.pipeline_mode<synchronous>, transform_indices = @transform_6, window_bounds = array<i64: 1, 128>}, {transform_indices = @transform_7, window_bounds = array<i64: 8, 128>}]} {
    %c0 = arith.constant 0 : index
    %c0_0 = arith.constant 0 : index
    %0 = vector.load %arg1[%c0, %c0_0] : memref<8x32xbf16, #tpu.memory_space<vmem>>, vector<8x32xbf16>
    %c0_1 = arith.constant 0 : index
    %c0_2 = arith.constant 0 : index
    %1 = vector.load %arg2[%c0_1, %c0_2] : memref<32x512xbf16, #tpu.memory_space<vmem>>, vector<32x512xbf16>
    %cst = arith.constant dense<0.000000e+00> : vector<8x512xf32>
    %2 = tpu.matmul %0, %1, %cst {dimension_numbers = #tpu.dot_dimension_numbers<[1], [0], [0], [1], [0, 0, 1, 1], [], []>} : vector<8x32xbf16>, vector<32x512xbf16>, vector<8x512xf32> -> vector<8x512xf32>
    %c0_3 = arith.constant 0 : index
    %c0_4 = arith.constant 0 : index
    %3 = vector.load %arg3[%c0_3, %c0_4] : memref<1x512xf32, #tpu.memory_space<vmem>>, vector<1x512xf32>
    %4 = vector.broadcast %3 : vector<1x512xf32> to vector<8x512xf32>
    %5 = arith.addf %2, %4 : vector<8x512xf32>
    %cst_5 = arith.constant 0.000000e+00 : f32
    %6 = vector.broadcast %cst_5 : f32 to vector<8x512xf32>
    %7 = arith.maximumf %5, %6 : vector<8x512xf32>
    %8 = arith.truncf %7 : vector<8x512xf32> to vector<8x512xbf16>
    %c0_6 = arith.constant 0 : index
    %c0_7 = arith.constant 0 : index
    %9 = vector.load %arg4[%c0_6, %c0_7] : memref<512x384xbf16, #tpu.memory_space<vmem>>, vector<512x384xbf16>
    %cst_8 = arith.constant dense<0.000000e+00> : vector<8x384xf32>
    %10 = tpu.matmul %8, %9, %cst_8 {dimension_numbers = #tpu.dot_dimension_numbers<[1], [0], [0], [1], [0, 0, 1, 1], [], []>} : vector<8x512xbf16>, vector<512x384xbf16>, vector<8x384xf32> -> vector<8x384xf32>
    %c0_9 = arith.constant 0 : index
    %c0_10 = arith.constant 0 : index
    %11 = vector.load %arg5[%c0_9, %c0_10] : memref<1x384xf32, #tpu.memory_space<vmem>>, vector<1x384xf32>
    %12 = vector.broadcast %11 : vector<1x384xf32> to vector<8x384xf32>
    %13 = arith.addf %10, %12 : vector<8x384xf32>
    %cst_11 = arith.constant 0.000000e+00 : f32
    %14 = vector.broadcast %cst_11 : f32 to vector<8x384xf32>
    %15 = arith.maximumf %13, %14 : vector<8x384xf32>
    %16 = arith.truncf %15 : vector<8x384xf32> to vector<8x384xbf16>
    %c0_12 = arith.constant 0 : index
    %c0_13 = arith.constant 0 : index
    %17 = vector.load %arg6[%c0_12, %c0_13] : memref<384x128xbf16, #tpu.memory_space<vmem>>, vector<384x128xbf16>
    %cst_14 = arith.constant dense<0.000000e+00> : vector<8x128xf32>
    %18 = tpu.matmul %16, %17, %cst_14 {dimension_numbers = #tpu.dot_dimension_numbers<[1], [0], [0], [1], [0, 0, 1, 1], [], []>} : vector<8x384xbf16>, vector<384x128xbf16>, vector<8x128xf32> -> vector<8x128xf32>
    %c0_15 = arith.constant 0 : index
    %c0_16 = arith.constant 0 : index
    %19 = vector.load %arg7[%c0_15, %c0_16] : memref<1x128xf32, #tpu.memory_space<vmem>>, vector<1x128xf32>
    %20 = vector.broadcast %19 : vector<1x128xf32> to vector<8x128xf32>
    %21 = arith.addf %18, %20 : vector<8x128xf32>
    %22 = arith.truncf %21 : vector<8x128xf32> to vector<8x128xbf16>
    %c0_17 = arith.constant 0 : index
    %c0_18 = arith.constant 0 : index
    %23 = vector.load %arg8[%c0_17, %c0_18] : memref<8x128xbf16, #tpu.memory_space<vmem>>, vector<8x128xbf16>
    tpu.vector_store %arg8[%c0_17, %c0_18], %22 {strides = array<i32>} : memref<8x128xbf16, #tpu.memory_space<vmem>>, vector<8x128xbf16>,
    return
  }
  func.func @transform_0(%arg0: i32) -> (i32, i32) {
    %c0_i32 = arith.constant 0 : i32
    %c0_i32_0 = arith.constant 0 : i32
    return %arg0, %c0_i32 : i32, i32
  }
  func.func @transform_1(%arg0: i32) -> (i32, i32) {
    %c0_i32 = arith.constant 0 : i32
    %c0_i32_0 = arith.constant 0 : i32
    %c0_i32_1 = arith.constant 0 : i32
    return %c0_i32, %c0_i32_0 : i32, i32
  }
  func.func @transform_2(%arg0: i32) -> (i32, i32) {
    %c0_i32 = arith.constant 0 : i32
    %c0_i32_0 = arith.constant 0 : i32
    %c0_i32_1 = arith.constant 0 : i32
    return %c0_i32, %c0_i32_0 : i32, i32
  }
  func.func @transform_3(%arg0: i32) -> (i32, i32) {
    %c0_i32 = arith.constant 0 : i32
    %c0_i32_0 = arith.constant 0 : i32
    %c0_i32_1 = arith.constant 0 : i32
    return %c0_i32, %c0_i32_0 : i32, i32
  }
  func.func @transform_4(%arg0: i32) -> (i32, i32) {
    %c0_i32 = arith.constant 0 : i32
    %c0_i32_0 = arith.constant 0 : i32
    %c0_i32_1 = arith.constant 0 : i32
    return %c0_i32, %c0_i32_0 : i32, i32
  }
  func.func @transform_5(%arg0: i32) -> (i32, i32) {
    %c0_i32 = arith.constant 0 : i32
    %c0_i32_0 = arith.constant 0 : i32
    %c0_i32_1 = arith.constant 0 : i32
    return %c0_i32, %c0_i32_0 : i32, i32
  }
  func.func @transform_6(%arg0: i32) -> (i32, i32) {
    %c0_i32 = arith.constant 0 : i32
    %c0_i32_0 = arith.constant 0 : i32
    %c0_i32_1 = arith.constant 0 : i32
    return %c0_i32, %c0_i32_0 : i32, i32
  }
  func.func @transform_7(%arg0: i32) -> (i32, i32) {
    %c0_i32 = arith.constant 0 : i32
    %c0_i32_0 = arith.constant 0 : i32
    return %arg0, %c0_i32 : i32, i32
  }
}

</mosaic_0001>

<bundles_post_ra>
// kernel: dqn_forward.1
= control target key start
LH: loop header
LB: loop body
LE: loop exit
PB: predicated region body
PF: predicated region fallthrough
CT: control target
= control target key end

     0   :  { %12 = vsyncpa [#allocation3], 0  ;;  %s1913_s0 = inlined_call_operand.vmem [shape: bf16[8,32], index: 0, kind: input, shape index: {}]   ;;  %s1914_s1 = inlined_call_operand.hbm [shape: bf16[32,512], index: 1, kind: input, shape index: {}]   ;;  %s1915_s2 = inlined_call_operand.vmem [shape: f32[1,512], index: 2, kind: input, shape index: {}]   ;;  %s1916_s3 = inlined_call_operand.hbm [shape: bf16[512,384], index: 3, kind: input, shape index: {}]   ;;  %s1917_s4 = inlined_call_operand.vmem [shape: f32[1,384], index: 4, kind: input, shape index: {}]   ;;  %s1918_s5 = inlined_call_operand.hbm [shape: bf16[384,128], index: 5, kind: input, shape index: {}]   ;;  %s1919_s6 = inlined_call_operand.vmem [shape: f32[1,128], index: 6, kind: input, shape index: {}]   ;;  %s1920_s7 = inlined_call_operand.vmem [shape: bf16[8,128], index: 7, kind: output, shape index: {}]  }
   0x1   :  { %13 = vsyncpa [#allocation5], 0  ;;  %s1811_s24 = smov [#allocation4]  }
   0x2   :  { %s35_s25 = sshll.u32 %s1811_s24, 4  ;;  %s36_s25 = int_to_ptr.vmem [resolvable:$true] %s35_s25 }
   0x3   :  { %s1755_s26 = scalar_lea.vmem %s36_s25, 12288  ;;  %p1760_p1 = scmp.lt.s32.totalorder %s36_s25, %s36_s25 }
   0x4   :  { %p1756_p0 = scmp.ne.s32.totalorder %s36_s25, %s1755_s26  ;;  %p1761_p2 = scmp.lt.s32.totalorder %s1755_s26, %s1755_s26 }
   0x6   :  { %p1762_p3 = por %p1761_p2, %p1760_p1 }
   0x8   :  { %p1763_p4 = pnand %p1762_p3, %p1756_p0 }
   0xa   :  { %1766 = shalt.err (!%p1763_p4)
}
   0xb   :  { %s1812_s27 = smov 192   ;;  %s1813_s28 = smov 12  }
   0xc   :  { %41 = dma.hbm_to_vmem [thread:$0]  %s1916_s3, 12288, %s36_s25, [#allocation5], %s1812_s27, %s1812_s27, %s1813_s28  }
   0xd   :  { %s1814_s8 = smov [#allocation2]  }
   0xe   :  { %s21_s9 = sshll.u32 %s1814_s8, 4  ;;  %s22_s9 = int_to_ptr.vmem [resolvable:$true] %s21_s9 }
   0xf   :  { %s1775_s10 = scalar_lea.vmem %s22_s9, 1024  ;;  %p1780_p6 = scmp.lt.s32.totalorder %s22_s9, %s22_s9 }
  0x10   :  { %p1776_p5 = scmp.ne.s32.totalorder %s22_s9, %s1775_s10  ;;  %p1781_p7 = scmp.lt.s32.totalorder %s1775_s10, %s1775_s10 }
  0x12   :  { %p1782_p8 = por %p1781_p7, %p1780_p6 }
  0x14   :  { %p1783_p9 = pnand %p1782_p8, %p1776_p5 }
  0x16   :  { %1786 = shalt.err (!%p1783_p9)
}
  0x17   :  { %s1815_s11 = smov 256   ;;  %s1816_s12 = smov 16  }
  0x18   :  { %27 = dma.hbm_to_vmem [thread:$0]  %s1914_s1, 1024, %s22_s9, [#allocation3], %s1815_s11, %s1815_s11, %s1816_s12  }
  0x19   :  { %s1817_s15 = smov [#allocation6]  }
  0x1a   :  { %s49_s16 = sshll.u32 %s1817_s15, 4  ;;  %s50_s16 = int_to_ptr.vmem [resolvable:$true] %s49_s16 }
  0x1b   :  { %s1795_s3 = scalar_lea.vmem %s50_s16, 3072  ;;  %p1800_p11 = scmp.lt.s32.totalorder %s50_s16, %s50_s16 }
  0x1c   :  { %p1796_p10 = scmp.ne.s32.totalorder %s50_s16, %s1795_s3  ;;  %p1801_p12 = scmp.lt.s32.totalorder %s1795_s3, %s1795_s3 }
  0x1e   :  { %p1802_p13 = por %p1801_p12, %p1800_p11 }
  0x20   :  { %p1803_p0 = pnand %p1802_p13, %p1796_p10 }
  0x22   :  { %1806 = shalt.err (!%p1803_p0)
}
  0x23   :  { %s1818_s17 = smov 64   ;;  %s1819_s18 = smov 4  }
  0x24   :  { %55 = dma.hbm_to_vmem [thread:$0]  %s1918_s5, 3072, %s50_s16, [#allocation5], %s1818_s17, %s1818_s17, %s1819_s18  }
  0x25   :  { %1807 = dma.done.wait [#allocation3], 1024  }
  0x26   :  { %1808 = vsyncadd [#allocation3], 4294966272 }
  0x27   :  { %1809 = dma.done.wait [#allocation5], 15360  }
  0x28   :  { %1810 = vsyncadd [#allocation5], 4294951936  ;;  %v1820_v0 = vmov 0   ;;  %v1583_v1 = vld [vmem:[#allocation2 + $0x24] ss:$16 sps:$4 sm:$0xff]   ;;  %vm139_vm0 = vcmask 261120  }
  0x29   :  { %175 = vmatprep.mubr.bf16.mxu0 %v1820_v0  ;;  %216 = vmatprep.mubr.bf16.mxu1 %v1820_v0  ;;  %v1585_v2 = vld [vmem:[#allocation2 + $0x2c] ss:$16 sps:$4 sm:$0xff]   ;;  %v1587_v3 = vld [vmem:[#allocation2 + $0x20] ss:$16 sps:$4 sm:$0xff]   ;;  %v1588_v4 = vld [vmem:[#allocation2 + $0x28] ss:$16 sps:$4 sm:$0xff]  }
  0x2a   :  { %155 = vmatprep.subr.bf16.mxu0 %v1583_v1  ;;  %196 = vmatprep.subr.bf16.mxu1 %v1585_v2  ;;  %v1589_v5 = vld [vmem:[#allocation2 + $0x4] ss:$16 sps:$4 sm:$0xff]   ;;  %v1591_v6 = vld [vmem:[#allocation2 + $0xc] ss:$16 sps:$4 sm:$0xff]   ;;  %v1593_v7 = vld [vmem:[#allocation2] ss:$16 sps:$4 sm:$0xff]  }
  0x2b   :  { %156 = vmatpush1.bf16.msra.mxu0 %v1587_v3  ;;  %197 = vmatpush1.bf16.msra.mxu1 %v1588_v4  ;;  %v1594_v8 = vld [vmem:[#allocation2 + $0x8] ss:$16 sps:$4 sm:$0xff]   ;;  %v68_v9 = vld [vmem:[%s1913_s0] sm:$0xf]  ;;  %v1601_v16 = vld [vmem:[#allocation4 + $0x90] ss:$12 sps:$4 sm:$0xff]  }
  0x2c   :  { %157 = vmatprep.subr.bf16.mxu0 %v1589_v5  ;;  %198 = vmatprep.subr.bf16.mxu1 %v1591_v6  ;;  %v1595_v10 = vld [vmem:[#allocation4 + $0xa8] ss:$12 sps:$4 sm:$0xff]   ;;  %v1597_v11 = vld [vmem:[#allocation4 + $0xac] ss:$12 sps:$4 sm:$0xff]   ;;  %v1604_v17 = vld [vmem:[#allocation4 + $0x210] ss:$12 sps:$4 sm:$0xff]  }
  0x2d   :  { %v1598_v12 = vld [vmem:[#allocation4 + $0x228] ss:$12 sps:$4 sm:$0xff]   ;;  %v1600_v13 = vld [vmem:[#allocation4 + $0x22c] ss:$12 sps:$4 sm:$0xff]   ;;  %v1615_v22 = vld [vmem:[#allocation4 + $0x64] ss:$12 sps:$4 sm:$0xff]  }
  0x2e   :  { %v1603_v14 = vld [vmem:[#allocation4 + $0x94] ss:$12 sps:$4 sm:$0xff]   ;;  %v1609_v18 = vld [vmem:[#allocation4 + $0x7c] ss:$12 sps:$4 sm:$0xff]   ;;  %v1607_v20 = vld [vmem:[#allocation4 + $0x78] ss:$12 sps:$4 sm:$0xff]  }
  0x2f   :  { %158 = vmatpush1.bf16.msra.mxu0 %v1593_v7  ;;  %199 = vmatpush1.bf16.msra.mxu1 %v1594_v8  ;;  %v1606_v15 = vld [vmem:[#allocation4 + $0x214] ss:$12 sps:$4 sm:$0xff]   ;;  %v1612_v19 = vld [vmem:[#allocation4 + $0x1fc] ss:$12 sps:$4 sm:$0xff]   ;;  %v1610_v21 = vld [vmem:[#allocation4 + $0x1f8] ss:$12 sps:$4 sm:$0xff]  }
  0x30   :  { %890 = vmatprep.subr.bf16.mxu0 %v1597_v11  ;;  %931 = vmatprep.subr.bf16.mxu1 %v1600_v13  ;;  %v1618_v23 = vld [vmem:[#allocation4 + $0x1e4] ss:$12 sps:$4 sm:$0xff]   ;;  %v1613_v24 = vld [vmem:[#allocation4 + $0x60] ss:$12 sps:$4 sm:$0xff]   ;;  %v1619_v28 = vld [vmem:[#allocation4 + $0x48] ss:$12 sps:$4 sm:$0xff]  }
  0x31   :  { %v1616_v25 = vld [vmem:[#allocation4 + $0x1e0] ss:$12 sps:$4 sm:$0xff]   ;;  %v1622_v29 = vld [vmem:[#allocation4 + $0x1c8] ss:$12 sps:$4 sm:$0xff]   ;;  %v1625_v32 = vld [vmem:[#allocation4 + $0x30] ss:$12 sps:$4 sm:$0xff]  }
  0x32   :  { %1353 = vmatmul.mubr.msk.bf16.vlgmr.msra.gmra.mxu0 %vm139_vm0, %v68_v9  ;;  %1354 = vmatmul.mubr.msk.bf16.vlgmr.msra.gmra.mxu1 %vm139_vm0, %v68_v9  ;;  %v1621_v26 = vld [vmem:[#allocation4 + $0x4c] ss:$12 sps:$4 sm:$0xff]   ;;  %v1627_v30 = vld [vmem:[#allocation4 + $0x34] ss:$12 sps:$4 sm:$0xff]   ;;  %v1628_v33 = vld [vmem:[#allocation4 + $0x1b0] ss:$12 sps:$4 sm:$0xff]  }
  0x33   :  { %891 = vmatpush1.bf16.msra.mxu0 %v1595_v10  ;;  %932 = vmatpush1.bf16.msra.mxu1 %v1598_v12  ;;  %v1624_v27 = vld [vmem:[#allocation4 + $0x1cc] ss:$12 sps:$4 sm:$0xff]   ;;  %v1630_v31 = vld [vmem:[#allocation4 + $0x1b4] ss:$12 sps:$4 sm:$0xff]   ;;  %v1633_v34 = vld [vmem:[#allocation4 + $0x1c] ss:$12 sps:$4 sm:$0xff]   ;;  %v79_v12 = vlaneseq }
  0x34   :  { %892 = vmatprep.subr.bf16.mxu0 %v1603_v14  ;;  %933 = vmatprep.subr.bf16.mxu1 %v1606_v15  ;;  %v1636_v35 = vld [vmem:[#allocation4 + $0x19c] ss:$12 sps:$4 sm:$0xff]   ;;  %v1631_v36 = vld [vmem:[#allocation4 + $0x18] ss:$12 sps:$4 sm:$0xff]   ;;  %v1637_v40 = vld [vmem:[#allocation4] ss:$12 sps:$4 sm:$0xff]  }
  0x35   :  { %v1634_v37 = vld [vmem:[#allocation4 + $0x198] ss:$12 sps:$4 sm:$0xff]   ;;  %v1640_v41 = vld [vmem:[#allocation4 + $0x180] ss:$12 sps:$4 sm:$0xff]   ;;  %v1643_v44 = vld [vmem:[#allocation4 + $0x168] ss:$12 sps:$4 sm:$0xff]  }
  0x36   :  { %v1639_v38 = vld [vmem:[#allocation4 + $0x4] ss:$12 sps:$4 sm:$0xff]   ;;  %v1645_v42 = vld [vmem:[#allocation4 + $0x16c] ss:$12 sps:$4 sm:$0xff]   ;;  %v1646_v45 = vld [vmem:[#allocation4 + $0x2e8] ss:$12 sps:$4 sm:$0xff]  }
  0x37   :  { %893 = vmatpush1.bf16.msra.mxu0 %v1601_v16  ;;  %934 = vmatpush1.bf16.msra.mxu1 %v1604_v17  ;;  %v1642_v39 = vld [vmem:[#allocation4 + $0x184] ss:$12 sps:$4 sm:$0xff]   ;;  %v1648_v43 = vld [vmem:[#allocation4 + $0x2ec] ss:$12 sps:$4 sm:$0xff]   ;;  %v1651_v46 = vld [vmem:[#allocation4 + $0x154] ss:$12 sps:$4 sm:$0xff]  }
  0x38   :  { %894 = vmatprep.subr.bf16.mxu0 %v1609_v18  ;;  %935 = vmatprep.subr.bf16.mxu1 %v1612_v19  ;;  %v1654_v47 = vld [vmem:[#allocation4 + $0x2d4] ss:$12 sps:$4 sm:$0xff]   ;;  %v1649_v48 = vld [vmem:[#allocation4 + $0x150] ss:$12 sps:$4 sm:$0xff]   ;;  %v1655_v52 = vld [vmem:[#allocation4 + $0x138] ss:$12 sps:$4 sm:$0xff]  }
  0x39   :  { %v1652_v49 = vld [vmem:[#allocation4 + $0x2d0] ss:$12 sps:$4 sm:$0xff]   ;;  %v1658_v53 = vld [vmem:[#allocation4 + $0x2b8] ss:$12 sps:$4 sm:$0xff]   ;;  %v1661_v56 = vld [vmem:[#allocation4 + $0x120] ss:$12 sps:$4 sm:$0xff]  }
  0x3a   :  { %v1657_v50 = vld [vmem:[#allocation4 + $0x13c] ss:$12 sps:$4 sm:$0xff]   ;;  %v1663_v54 = vld [vmem:[#allocation4 + $0x124] ss:$12 sps:$4 sm:$0xff]   ;;  %v1664_v57 = vld [vmem:[#allocation4 + $0x2a0] ss:$12 sps:$4 sm:$0xff]  }
  0x3b   :  { %895 = vmatpush1.bf16.msra.mxu0 %v1607_v20  ;;  %936 = vmatpush1.bf16.msra.mxu1 %v1610_v21  ;;  %v1660_v51 = vld [vmem:[#allocation4 + $0x2bc] ss:$12 sps:$4 sm:$0xff]   ;;  %v1666_v55 = vld [vmem:[#allocation4 + $0x2a4] ss:$12 sps:$4 sm:$0xff]   ;;  %v1669_v58 = vld [vmem:[#allocation4 + $0x10c] ss:$12 sps:$4 sm:$0xff]  }
  0x3c   :  { %896 = vmatprep.subr.bf16.mxu0 %v1615_v22  ;;  %937 = vmatprep.subr.bf16.mxu1 %v1618_v23  ;;  %v1672_v59 = vld [vmem:[#allocation4 + $0x28c] ss:$12 sps:$4 sm:$0xff]   ;;  %v1667_v60 = vld [vmem:[#allocation4 + $0x108] ss:$12 sps:$4 sm:$0xff]   ;;  %v1673_v0 = vld [vmem:[#allocation4 + $0xf0] ss:$12 sps:$4 sm:$0xff]  }
  0x3d   :  { %v1670_v61 = vld [vmem:[#allocation4 + $0x288] ss:$12 sps:$4 sm:$0xff]   ;;  %v1676_v1 = vld [vmem:[#allocation4 + $0x270] ss:$12 sps:$4 sm:$0xff]   ;;  %v1679_v4 = vld [vmem:[#allocation4 + $0xd8] ss:$12 sps:$4 sm:$0xff]  }
  0x3e   :  { %v1675_v62 = vld [vmem:[#allocation4 + $0xf4] ss:$12 sps:$4 sm:$0xff]   ;;  %v1681_v2 = vld [vmem:[#allocation4 + $0xdc] ss:$12 sps:$4 sm:$0xff]   ;;  %v1682_v5 = vld [vmem:[#allocation4 + $0x258] ss:$12 sps:$4 sm:$0xff]  }
  0x3f   :  { %897 = vmatpush1.bf16.msra.mxu0 %v1613_v24  ;;  %938 = vmatpush1.bf16.msra.mxu1 %v1616_v25  ;;  %v1678_v63 = vld [vmem:[#allocation4 + $0x274] ss:$12 sps:$4 sm:$0xff]   ;;  %v1684_v3 = vld [vmem:[#allocation4 + $0x25c] ss:$12 sps:$4 sm:$0xff]   ;;  %v1687_v6 = vld [vmem:[#allocation4 + $0xc4] ss:$12 sps:$4 sm:$0xff]  }
  0x40   :  { %898 = vmatprep.subr.bf16.mxu0 %v1621_v26  ;;  %939 = vmatprep.subr.bf16.mxu1 %v1624_v27  ;;  %v1690_v7 = vld [vmem:[#allocation4 + $0x244] ss:$12 sps:$4 sm:$0xff]   ;;  %v1685_v8 = vld [vmem:[#allocation4 + $0xc0] ss:$12 sps:$4 sm:$0xff]   ;;  %v1875_v13 = vshrl.u32 %v79_v12, 7  ;;  %vm1822_vm1 = vmmov 0  }
  0x41   :  { %v1688_v9 = vld [vmem:[#allocation4 + $0x240] ss:$12 sps:$4 sm:$0xff]   ;;  %v1691_v10 = vld [vmem:[#allocation4 + $0x170] ss:$12 sps:$4 sm:$0xff]  }
  0x42   :  { %v1692_v11 = vld [vmem:[#allocation4 + $0x2f0] ss:$12 sps:$4 sm:$0xff]   ;;  %v81_v14 = vsub.s32 0, %v1875_v13  ;;  %v89_v15 = vsub.s32 2, %v1875_v13  ;;  %v77_v16 = vld [vmem:[%s1915_s2] sm:$0xf] }
  0x43   :  { %899 = vmatpush1.bf16.msra.mxu0 %v1619_v28  ;;  %940 = vmatpush1.bf16.msra.mxu1 %v1622_v29  ;;  %v85_v17 = vsub.s32 1, %v1875_v13  ;;  %v93_v18 = vsub.s32 3, %v1875_v13  ;;  %v1726_v12 = vld [vmem:[#allocation6 + $0x30] sm:$0xff]   ;;  %v1451_v13 = vld [vmem:[%s1919_s6] ss:$0 sm:$0xff] }
  0x44   :  { %900 = vmatprep.subr.bf16.mxu0 %v1627_v30  ;;  %941 = vmatprep.subr.bf16.mxu1 %v1630_v31  ;;  %v82_v19 = vrot.slane %v77_v16, %v81_v14  ;;  %v90_v20 = vrot.slane %v77_v16, %v89_v15 }
  0x45   :  { %v86_v21 = vrot.slane %v77_v16, %v85_v17  ;;  %v94_v22 = vrot.slane %v77_v16, %v93_v18  ;;  %v1727_v16 = vld [vmem:[#allocation6 + $0x68] sm:$0xff]  }
  0x46   :  { %v1728_v18 = vld [vmem:[#allocation6 + $0x28] sm:$0xff]  }
  0x47   :  { %901 = vmatpush1.bf16.msra.mxu0 %v1625_v32  ;;  %942 = vmatpush1.bf16.msra.mxu1 %v1628_v33 }
  0x48   :  { %902 = vmatprep.subr.bf16.mxu0 %v1633_v34  ;;  %943 = vmatprep.subr.bf16.mxu1 %v1636_v35 }
  0x4b   :  { %903 = vmatpush1.bf16.msra.mxu0 %v1631_v36  ;;  %944 = vmatpush1.bf16.msra.mxu1 %v1634_v37 }
  0x4c   :  { %904 = vmatprep.subr.bf16.mxu0 %v1639_v38  ;;  %945 = vmatprep.subr.bf16.mxu1 %v1642_v39 }
  0x4f   :  { %905 = vmatpush1.bf16.msra.mxu0 %v1637_v40  ;;  %946 = vmatpush1.bf16.msra.mxu1 %v1640_v41 }
  0x50   :  { %906 = vmatprep.subr.bf16.mxu0 %v1645_v42  ;;  %947 = vmatprep.subr.bf16.mxu1 %v1648_v43  ;;  %v1693_v42 = vld [vmem:[#allocation4 + $0xb0] ss:$12 sps:$4 sm:$0xff]  }
  0x51   :  { %v1694_v43 = vld [vmem:[#allocation4 + $0x230] ss:$12 sps:$4 sm:$0xff]  }
  0x53   :  { %907 = vmatpush2.bf16.msra.mxu0 %v1643_v44  ;;  %948 = vmatpush2.bf16.msra.mxu1 %v1646_v45  ;;  %v1695_v45 = vld [vmem:[#allocation4 + $0x158] ss:$12 sps:$4 sm:$0xff]  }
  0x54   :  { %908 = vmatprep.subr.bf16.mxu0 %v1651_v46  ;;  %949 = vmatprep.subr.bf16.mxu1 %v1654_v47  ;;  %v1696_v46 = vld [vmem:[#allocation4 + $0x2d8] ss:$12 sps:$4 sm:$0xff]  }
  0x55   :  { %v1697_v47 = vld [vmem:[#allocation4 + $0x98] ss:$12 sps:$4 sm:$0xff]  }
  0x57   :  { %909 = vmatpush2.bf16.msra.mxu0 %v1649_v48  ;;  %950 = vmatpush2.bf16.msra.mxu1 %v1652_v49  ;;  %v1698_v48 = vld [vmem:[#allocation4 + $0x218] ss:$12 sps:$4 sm:$0xff]   ;;  %v1699_v49 = vld [vmem:[#allocation4 + $0x140] ss:$12 sps:$4 sm:$0xff]  }
  0x58   :  { %910 = vmatprep.subr.bf16.mxu0 %v1657_v50  ;;  %951 = vmatprep.subr.bf16.mxu1 %v1660_v51  ;;  %v1700_v50 = vld [vmem:[#allocation4 + $0x2c0] ss:$12 sps:$4 sm:$0xff]  }
  0x59   :  { %v1701_v51 = vld [vmem:[#allocation4 + $0x80] ss:$12 sps:$4 sm:$0xff]  }
  0x5b   :  { %911 = vmatpush2.bf16.msra.mxu0 %v1655_v52  ;;  %952 = vmatpush2.bf16.msra.mxu1 %v1658_v53  ;;  %v1702_v52 = vld [vmem:[#allocation4 + $0x200] ss:$12 sps:$4 sm:$0xff]   ;;  %v1703_v53 = vld [vmem:[#allocation4 + $0x128] ss:$12 sps:$4 sm:$0xff]  }
  0x5c   :  { %912 = vmatprep.subr.bf16.mxu0 %v1663_v54  ;;  %953 = vmatprep.subr.bf16.mxu1 %v1666_v55  ;;  %v1704_v54 = vld [vmem:[#allocation4 + $0x2a8] ss:$12 sps:$4 sm:$0xff]  }
  0x5d   :  { %v1705_v55 = vld [vmem:[#allocation4 + $0x68] ss:$12 sps:$4 sm:$0xff]  }
  0x5f   :  { %913 = vmatpush2.bf16.msra.mxu0 %v1661_v56  ;;  %954 = vmatpush2.bf16.msra.mxu1 %v1664_v57  ;;  %v1706_v56 = vld [vmem:[#allocation4 + $0x1e8] ss:$12 sps:$4 sm:$0xff]   ;;  %v1707_v57 = vld [vmem:[#allocation4 + $0x110] ss:$12 sps:$4 sm:$0xff]  }
  0x60   :  { %914 = vmatprep.subr.bf16.mxu0 %v1669_v58  ;;  %955 = vmatprep.subr.bf16.mxu1 %v1672_v59  ;;  %v1708_v58 = vld [vmem:[#allocation4 + $0x290] ss:$12 sps:$4 sm:$0xff]  }
  0x61   :  { %v1709_v59 = vld [vmem:[#allocation4 + $0x50] ss:$12 sps:$4 sm:$0xff]  }
  0x63   :  { %915 = vmatpush2.bf16.msra.mxu0 %v1667_v60  ;;  %956 = vmatpush2.bf16.msra.mxu1 %v1670_v61  ;;  %v1710_v60 = vld [vmem:[#allocation4 + $0x1d0] ss:$12 sps:$4 sm:$0xff]   ;;  %v1711_v61 = vld [vmem:[#allocation4 + $0xf8] ss:$12 sps:$4 sm:$0xff]  }
  0x64   :  { %916 = vmatprep.subr.bf16.mxu0 %v1675_v62  ;;  %957 = vmatprep.subr.bf16.mxu1 %v1678_v63  ;;  %v1712_v62 = vld [vmem:[#allocation4 + $0x278] ss:$12 sps:$4 sm:$0xff]  }
  0x65   :  { %v1713_v63 = vld [vmem:[#allocation4 + $0x38] ss:$12 sps:$4 sm:$0xff]  }
  0x67   :  { %917 = vmatpush2.bf16.msra.mxu0 %v1673_v0  ;;  %958 = vmatpush2.bf16.msra.mxu1 %v1676_v1  ;;  %v1714_v0 = vld [vmem:[#allocation4 + $0x1b8] ss:$12 sps:$4 sm:$0xff]   ;;  %v1715_v1 = vld [vmem:[#allocation4 + $0xe0] ss:$12 sps:$4 sm:$0xff]  }
  0x68   :  { %918 = vmatprep.subr.bf16.mxu0 %v1681_v2  ;;  %959 = vmatprep.subr.bf16.mxu1 %v1684_v3  ;;  %v1716_v2 = vld [vmem:[#allocation4 + $0x260] ss:$12 sps:$4 sm:$0xff]  }
  0x69   :  { %v1717_v3 = vld [vmem:[#allocation4 + $0x20] ss:$12 sps:$4 sm:$0xff]  }
  0x6b   :  { %919 = vmatpush2.bf16.msra.mxu0 %v1679_v4  ;;  %960 = vmatpush2.bf16.msra.mxu1 %v1682_v5  ;;  %v1718_v4 = vld [vmem:[#allocation4 + $0x1a0] ss:$12 sps:$4 sm:$0xff]   ;;  %v1719_v5 = vld [vmem:[#allocation4 + $0xc8] ss:$12 sps:$4 sm:$0xff]  }
  0x6c   :  { %920 = vmatprep.subr.bf16.mxu0 %v1687_v6  ;;  %961 = vmatprep.subr.bf16.mxu1 %v1690_v7  ;;  %v1720_v6 = vld [vmem:[#allocation4 + $0x248] ss:$12 sps:$4 sm:$0xff]  }
  0x6d   :  { %v1721_v7 = vld [vmem:[#allocation4 + $0x8] ss:$12 sps:$4 sm:$0xff]  }
  0x6f   :  { %921 = vmatpush2.bf16.msra.mxu0 %v1685_v8  ;;  %962 = vmatpush2.bf16.msra.mxu1 %v1688_v9  ;;  %v1722_v8 = vld [vmem:[#allocation4 + $0x188] ss:$12 sps:$4 sm:$0xff]   ;;  %v1723_v9 = vld [vmem:[#allocation6 + $0x78] sm:$0xff]  }
  0x70   :  { %1476 = vmatprep.subr.bf16.mxu0 %v1691_v10  ;;  %1498 = vmatprep.subr.bf16.mxu1 %v1692_v11  ;;  %v1724_v10 = vld [vmem:[#allocation6 + $0x38] sm:$0xff]   ;;  %v1725_v11 = vld [vmem:[#allocation6 + $0x70] sm:$0xff]  }
  0xf2   :  { %v177_v23 = vpop.f32.mrf.mxu0  ;;  %v218_v24 = vpop.f32.mrf.mxu1 }
  0xf3   :  { %v178_v25 = vadd.f32 %v177_v23, %v82_v19  ;;  %v219_v26 = vadd.f32 %v218_v24, %v90_v20  ;;  %v1729_v19 = vld [vmem:[#allocation6 + $0x60] sm:$0xff]   ;;  %v1733_v23 = vld [vmem:[#allocation6 + $0x50] sm:$0xff]  }
  0xf4   :  { %v179_v27 = vpop.f32.mrf.mxu0  ;;  %v220_v28 = vpop.f32.mrf.mxu1  ;;  %v1730_v20 = vld [vmem:[#allocation6 + $0x20] sm:$0xff]   ;;  %v1734_v24 = vld [vmem:[#allocation6 + $0x10] sm:$0xff]  }
  0xf5   :  { %v227_v29 = vmax.f32 %v219_v26, 0.0  ;;  %v180_v30 = vadd.f32 %v179_v27, %v86_v21  ;;  %v221_v31 = vadd.f32 %v220_v28, %v94_v22  ;;  %v225_v32 = vmax.f32 %v178_v25, 0.0  ;;  %v1731_v21 = vld [vmem:[#allocation6 + $0x58] sm:$0xff]   ;;  %v1735_v25 = vld [vmem:[#allocation6 + $0x48] sm:$0xff]   ;;  %v1737_v27 = vld [vmem:[#allocation6 + $0x40] sm:$0xff]  }
  0xf6   :  { %v181_v33 = vpop.f32.mrf.mxu0  ;;  %v222_v34 = vpop.f32.mrf.mxu1  ;;  %v1732_v22 = vld [vmem:[#allocation6 + $0x18] sm:$0xff]   ;;  %v1736_v26 = vld [vmem:[#allocation6 + $0x8] sm:$0xff]   ;;  %v1738_v28 = vld [vmem:[#allocation6] sm:$0xff]  }
  0xf7   :  { %v226_v35 = vmax.f32 %v180_v30, 0.0  ;;  %v228_v36 = vmax.f32 %v221_v31, 0.0  ;;  %v1890_v37 = vpack.c.bf16 %v227_v29, %v227_v29  ;;  %v1892_v44 = vpack.c.bf16 %v225_v32, %v225_v32  ;;  %v1739_v29 = vld [vmem:[#allocation6 + $0xb8] sm:$0xff]   ;;  %v1740_v31 = vld [vmem:[#allocation6 + $0xb0] sm:$0xff]   ;;  %v1741_v32 = vld [vmem:[#allocation6 + $0xa8] sm:$0xff]  }
  0xf8   :  { %v182_v38 = vpop.f32.mrf.mxu0  ;;  %v223_v39 = vpop.f32.mrf.mxu1  ;;  %v1821_v30 = vmov 0.0   ;;  %v1742_v33 = vld [vmem:[#allocation6 + $0xa0] sm:$0xff]   ;;  %v1743_v34 = vld [vmem:[#allocation6 + $0x98] sm:$0xff]  }
  0xf9   :  { %v230_v40 = vpack.c.bf16 %v226_v35, %v226_v35  ;;  %v232_v41 = vpack.c.bf16 %v228_v36, %v228_v36  ;;  %v1744_v35 = vld [vmem:[#allocation6 + $0x90] sm:$0xff]   ;;  %v1745_v36 = vld [vmem:[#allocation6 + $0x88] sm:$0xff]   ;;  %v361_v38 = vld [vmem:[%s1917_s4] sm:$0x7] }
  0xfa   :  { %v366_v39 = vrot.slane %v361_v38, %v81_v14 }
  0xfb   :  { %922 = vmatprep.mubr.bf16.mxu0 %v230_v40  ;;  %963 = vmatprep.mubr.bf16.mxu1 %v232_v41 }
  0xfc   :  { %923 = vmatmul.mubr.bf16.vlgmr.msra.gmra.mxu0 %v1892_v44  ;;  %964 = vmatmul.mubr.bf16.vlgmr.msra.gmra.mxu1 %v1890_v37 }
  0xfd   :  { %1477 = vmatpush3.bf16.msra.mxu0 %v1693_v42  ;;  %1499 = vmatpush3.bf16.msra.mxu1 %v1694_v43 }
  0xfe   :  { %1004 = vmatprep.mubr.bf16.mxu0 %v230_v40  ;;  %1044 = vmatprep.mubr.bf16.mxu1 %v232_v41  ;;  %v370_v40 = vrot.slane %v361_v38, %v85_v17 }
  0xff   :  { %1478 = vmatprep.subr.bf16.mxu0 %v1695_v45  ;;  %1500 = vmatprep.subr.bf16.mxu1 %v1696_v46 }
 0x101   :  { %1479 = vmatpush3.bf16.msra.mxu0 %v1697_v47  ;;  %1501 = vmatpush3.bf16.msra.mxu1 %v1698_v48 }
 0x102   :  { %1480 = vmatprep.subr.bf16.mxu0 %v1699_v49  ;;  %1502 = vmatprep.subr.bf16.mxu1 %v1700_v50 }
 0x105   :  { %1481 = vmatpush3.bf16.msra.mxu0 %v1701_v51  ;;  %1503 = vmatpush3.bf16.msra.mxu1 %v1702_v52 }
 0x106   :  { %1482 = vmatprep.subr.bf16.mxu0 %v1703_v53  ;;  %1504 = vmatprep.subr.bf16.mxu1 %v1704_v54 }
 0x109   :  { %1483 = vmatpush3.bf16.msra.mxu0 %v1705_v55  ;;  %1505 = vmatpush3.bf16.msra.mxu1 %v1706_v56 }
 0x10a   :  { %1484 = vmatprep.subr.bf16.mxu0 %v1707_v57  ;;  %1506 = vmatprep.subr.bf16.mxu1 %v1708_v58  ;;  %v374_v57 = vrot.slane %v361_v38, %v89_v15 }
 0x10d   :  { %1485 = vmatpush3.bf16.msra.mxu0 %v1709_v59  ;;  %1507 = vmatpush3.bf16.msra.mxu1 %v1710_v60 }
 0x10e   :  { %1486 = vmatprep.subr.bf16.mxu0 %v1711_v61  ;;  %1508 = vmatprep.subr.bf16.mxu1 %v1712_v62 }
 0x111   :  { %1487 = vmatpush3.bf16.msra.mxu0 %v1713_v63  ;;  %1509 = vmatpush3.bf16.msra.mxu1 %v1714_v0 }
 0x112   :  { %1488 = vmatprep.subr.bf16.mxu0 %v1715_v1  ;;  %1510 = vmatprep.subr.bf16.mxu1 %v1716_v2 }
 0x115   :  { %1489 = vmatpush3.bf16.msra.mxu0 %v1717_v3  ;;  %1511 = vmatpush3.bf16.msra.mxu1 %v1718_v4 }
 0x116   :  { %1490 = vmatprep.subr.bf16.mxu0 %v1719_v5  ;;  %1512 = vmatprep.subr.bf16.mxu1 %v1720_v6 }
 0x119   :  { %1491 = vmatpush3.bf16.msra.mxu0 %v1721_v7  ;;  %1513 = vmatpush3.bf16.msra.mxu1 %v1722_v8 }
 0x11a   :  { %1520 = vmatprep.subr.bf16.mxu0 %v1723_v9  ;;  %1551 = vmatprep.subr.bf16.mxu1 %v1821_v30 }
 0x11c   :  { %1005 = vmatmul.mubr.bf16.vlgmr.msra.gmra.mxu0 %v1892_v44  ;;  %1045 = vmatmul.mubr.bf16.vlgmr.msra.gmra.mxu1 %v1890_v37  ;;  %v1746_v37 = vld [vmem:[#allocation6 + $0x80] sm:$0xff]  }
 0x11d   :  { %1521 = vmatpush3.bf16.msra.mxu0 %v1724_v10  ;;  %1552 = vmatpush3.bf16.msra.mxu1 %v1739_v29 }
 0x11e   :  { %1522 = vmatprep.subr.bf16.mxu0 %v1725_v11  ;;  %1553 = vmatprep.subr.bf16.mxu1 %v1821_v30 }
 0x11f   :  { %1567 = vmatprep.mubr.msk.bf16.mxu1 %vm1822_vm1, %v1821_v30 }
 0x121   :  { %1523 = vmatpush3.bf16.msra.mxu0 %v1726_v12  ;;  %1554 = vmatpush3.bf16.msra.mxu1 %v1740_v31 }
 0x122   :  { %1524 = vmatprep.subr.bf16.mxu0 %v1727_v16  ;;  %1555 = vmatprep.subr.bf16.mxu1 %v1821_v30 }
 0x125   :  { %1525 = vmatpush3.bf16.msra.mxu0 %v1728_v18  ;;  %1556 = vmatpush3.bf16.msra.mxu1 %v1741_v32 }
 0x126   :  { %1526 = vmatprep.subr.bf16.mxu0 %v1729_v19  ;;  %1557 = vmatprep.subr.bf16.mxu1 %v1821_v30 }
 0x129   :  { %1527 = vmatpush3.bf16.msra.mxu0 %v1730_v20  ;;  %1558 = vmatpush3.bf16.msra.mxu1 %v1742_v33 }
 0x12a   :  { %1528 = vmatprep.subr.bf16.mxu0 %v1731_v21  ;;  %1559 = vmatprep.subr.bf16.mxu1 %v1821_v30 }
 0x12d   :  { %1529 = vmatpush3.bf16.msra.mxu0 %v1732_v22  ;;  %1560 = vmatpush3.bf16.msra.mxu1 %v1743_v34 }
 0x12e   :  { %1530 = vmatprep.subr.bf16.mxu0 %v1733_v23  ;;  %1561 = vmatprep.subr.bf16.mxu1 %v1821_v30 }
 0x131   :  { %1531 = vmatpush3.bf16.msra.mxu0 %v1734_v24  ;;  %1562 = vmatpush3.bf16.msra.mxu1 %v1744_v35 }
 0x132   :  { %1532 = vmatprep.subr.bf16.mxu0 %v1735_v25  ;;  %1563 = vmatprep.subr.bf16.mxu1 %v1821_v30 }
 0x135   :  { %1533 = vmatpush3.bf16.msra.mxu0 %v1736_v26  ;;  %1564 = vmatpush3.bf16.msra.mxu1 %v1745_v36 }
 0x136   :  { %1534 = vmatprep.subr.bf16.mxu0 %v1737_v27  ;;  %1565 = vmatprep.subr.bf16.mxu1 %v1821_v30 }
 0x139   :  { %1535 = vmatpush3.bf16.msra.mxu0 %v1738_v28  ;;  %1566 = vmatpush3.bf16.msra.mxu1 %v1746_v37 }
 0x1bc   :  { %v924_v41 = vpop.f32.mrf.mxu0  ;;  %v965_v42 = vpop.f32.mrf.mxu1 }
 0x1bd   :  { %v925_v43 = vadd.f32 %v924_v41, %v366_v39 }
 0x1be   :  { %v926_v44 = vpop.f32.mrf.mxu0  ;;  %v967_v45 = vpop.f32.mrf.mxu1 }
 0x1bf   :  { %v966_v46 = vadd.f32 %v965_v42, %v925_v43  ;;  %v927_v47 = vadd.f32 %v926_v44, %v370_v40 }
 0x1c0   :  { %v928_v48 = vpop.f32.mrf.mxu0  ;;  %v969_v49 = vpop.f32.mrf.mxu1 }
 0x1c1   :  { %v968_v50 = vadd.f32 %v967_v45, %v927_v47  ;;  %v1052_v51 = vmax.f32 %v966_v46, 0.0 }
 0x1c2   :  { %v929_v52 = vpop.f32.mrf.mxu0  ;;  %v970_v53 = vpop.f32.mrf.mxu1 }
 0x1c3   :  { %v1053_v54 = vmax.f32 %v968_v50, 0.0  ;;  %v1055_v56 = vpack.c.bf16 %v1052_v51, %v1052_v51 }
 0x1c5   :  { %v1056_v55 = vpack.c.bf16 %v1053_v54, %v1053_v54 }
 0x1c7   :  { %1289 = vmatprep.mubr.bf16.mxu0 %v1056_v55 }
 0x1c8   :  { %1290 = vmatmul.mubr.bf16.vlgmr.msra.gmra.mxu0 %v1055_v56 }
 0x1dc   :  { %v1492_v14 = vpop.f32.mrf.mxu0  ;;  %v1514_v17 = vpop.f32.mrf.mxu1 }
 0x1de   :  { %v1493_v58 = vpop.f32.mrf.mxu0  ;;  %v1515_v59 = vpop.f32.mrf.mxu1 }
 0x1df   :  { %v1494_v60 = vadd.f32 %v1493_v58, %v1492_v14  ;;  %v1516_v0 = vadd.f32 %v1515_v59, %v1514_v17 }
 0x1e0   :  { %v1495_v61 = vpop.f32.mrf.mxu0  ;;  %v1517_v62 = vpop.f32.mrf.mxu1 }
 0x1e1   :  { %v1007_v63 = vadd.f32 %v1494_v60, %v374_v57 }
 0x1e2   :  { %v1496_v1 = vpop.f32.mrf.mxu0  ;;  %v1518_v2 = vpop.f32.mrf.mxu1 }
 0x1e3   :  { %v1047_v3 = vadd.f32 %v1516_v0, %v1007_v63 }
 0x1e5   :  { %v1054_v4 = vmax.f32 %v1047_v3, 0.0 }
 0x1e7   :  { %v1057_v5 = vpack.c.bf16 %v1054_v4, %v1054_v4 }
 0x1e9   :  { %1568 = vmatmul.mubr.bf16.vlgmr.msra.gmra.mxu1 %v1057_v5 }
 0x288   :  { %v1536_v6 = vpop.f32.mrf.mxu0 }
 0x28a   :  { %v1537_v7 = vpop.f32.mrf.mxu0 }
 0x28b   :  { %v1538_v10 = vadd.f32 %v1537_v7, %v1536_v6 }
 0x28c   :  { %v1539_v8 = vpop.f32.mrf.mxu0 }
 0x28d   :  { %v1292_v15 = vadd.f32 %v1538_v10, %v1451_v13 }
 0x28e   :  { %v1540_v9 = vpop.f32.mrf.mxu0 }
 0x2a9   :  { %v1331_v11 = vpop.f32.mrf.mxu1 }
 0x2aa   :  { %v1332_v12 = vadd.f32 %v1331_v11, %v1292_v15 }
 0x2ab   :  { %v1569_v16 = vpop.f32.mrf.mxu1 }
 0x2ac   :  { %v1337_v18 = vpack.c.bf16 %v1332_v12, %v1332_v12 }
 0x2ad   :  { %v1334_v19 = vpop.f32.mrf.mxu1 }
 0x2ae   :  { %1338 = vst [vmem:[%s1920_s7] sm:$0xf] %v1337_v18 }
 0x2af   :  { %v1570_v20 = vpop.f32.mrf.mxu1 }
 0x2b0   :  { %1343 = vsyncpa [#allocation3], 1 }
 0x2b1   :  { %1344 = vsyncpa [#allocation5], 1 }

</bundles_post_ra>
